<compile_context>
chip_gen: v7x
topology: tpu7x:2x2x1
jax: 0.10.0
libtpu: 0.0.40
codegen_flags: <defaults>
</compile_context>

<pallas_src>
import jax
import jax.numpy as jnp
from jax.experimental import pallas as pl
from jax.experimental.pallas import tpu as pltpu

BN_EPS = 1e-5
GROWTH = 32
BLOCK_CONFIG = (6, 12, 24, 16)
INIT_FEATURES = 64
BN_SIZE = 4

# --------------------------- compiler params ---------------------------

_VMEM_LIMIT_CACHE = [None]


def _vmem_limit():
    """Generation-aware VMEM budget (<=70% of per-core capacity, capped at 64 MiB)."""
    if _VMEM_LIMIT_CACHE[0] is None:
        try:
            cap = int(pltpu.get_tpu_info().vmem_capacity_bytes)
        except Exception:
            cap = 128 * 1024 * 1024
        _VMEM_LIMIT_CACHE[0] = min(64 * 1024 * 1024, int(cap * 0.70))
    return _VMEM_LIMIT_CACHE[0]


def _grid_params():
    return pltpu.CompilerParams(dimension_semantics=("parallel",),
                                vmem_limit_bytes=_vmem_limit())


def _plain_params():
    return pltpu.CompilerParams(vmem_limit_bytes=_vmem_limit())


def _pick_tile(m, target):
    """Largest row-tile <= target that divides m and is a multiple of 8 (or m itself)."""
    if m <= target:
        return m
    cand = (min(target, m) // 8) * 8
    while cand >= 8:
        if m % cand == 0:
            return cand
        cand -= 8
    return m  # fallback: single (possibly large) block


# ------------------- fused (BN+ReLU) -> conv -> (BN+ReLU) -------------------

def _fused_matmul_kernel_factory(n_chunks, widths, has_prologue, epilogue, out_dtype):
    """Build a kernel: out = epi( sum_i dot( pro(chunk_i), W[off_i:off_i+C_i] ) )."""

    def kernel(*refs):
        idx = 0
        chunk_refs = refs[:n_chunks]
        idx = n_chunks
        w_ref = refs[idx]; idx += 1
        if has_prologue:
            ps_ref, pb_ref = refs[idx], refs[idx + 1]; idx += 2
        if epilogue == "bn_relu":
            es_ref, eb_ref = refs[idx], refs[idx + 1]; idx += 2
        out_ref = refs[idx]

        acc = jnp.zeros(out_ref.shape, jnp.float32)
        off = 0
        for ci, cref in zip(widths, chunk_refs):
            a = cref[...]
            if has_prologue:
                s = ps_ref[...][:, off:off + ci]
                b = pb_ref[...][:, off:off + ci]
                a = jnp.maximum(a.astype(jnp.float32) * s + b, 0.0)
            a = a.astype(jnp.bfloat16)
            acc = acc + jnp.dot(a, w_ref[off:off + ci, :],
                                preferred_element_type=jnp.float32)
            off += ci
        if epilogue == "bn_relu":
            acc = jnp.maximum(acc * es_ref[...] + eb_ref[...], 0.0)
        out_ref[...] = acc.astype(out_dtype)

    return kernel


def fused_conv_matmul(chunks, w_mat, *, prologue=None, epilogue_bn=None,
                      out_dtype=jnp.bfloat16, tm_target=256):
    """chunks: list of (M, C_i) arrays (virtual concat along channels).
    w_mat: (sum(C_i), Cout).  prologue/epilogue_bn: optional (scale, shift) for fused
    BN+ReLU applied before / after the matmul.  Returns (M, Cout) in out_dtype."""
    m = chunks[0].shape[0]
    widths = tuple(int(c.shape[1]) for c in chunks)
    c_total = sum(widths)
    cout = int(w_mat.shape[1])
    assert int(w_mat.shape[0]) == c_total
    tm = _pick_tile(m, tm_target)

    args, in_specs = [], []
    for c, ci in zip(chunks, widths):
        args.append(c.astype(jnp.bfloat16))
        in_specs.append(pl.BlockSpec((tm, ci), lambda i: (i, 0)))
    args.append(w_mat.astype(jnp.bfloat16))
    in_specs.append(pl.BlockSpec((c_total, cout), lambda i: (0, 0)))
    if prologue is not None:
        s, b = prologue
        args += [s.reshape(1, c_total).astype(jnp.float32),
                 b.reshape(1, c_total).astype(jnp.float32)]
        in_specs += [pl.BlockSpec((1, c_total), lambda i: (0, 0))] * 2
    if epilogue_bn is not None:
        s, b = epilogue_bn
        args += [s.reshape(1, cout).astype(jnp.float32),
                 b.reshape(1, cout).astype(jnp.float32)]
        in_specs += [pl.BlockSpec((1, cout), lambda i: (0, 0))] * 2

    kern = _fused_matmul_kernel_factory(
        len(chunks), widths, prologue is not None,
        "bn_relu" if epilogue_bn is not None else None, out_dtype)

    return pl.pallas_call(
        kern,
        grid=(m // tm,),
        in_specs=in_specs,
        out_specs=pl.BlockSpec((tm, cout), lambda i: (i, 0)),
        out_shape=jax.ShapeDtypeStruct((m, cout), out_dtype),
        compiler_params=_grid_params(),
    )(*args)


# ----------------------------- pooling kernels -----------------------------

def _reduce_max_kernel(x_ref, o_ref):
    o_ref[...] = jnp.max(x_ref[...], axis=0)


def _reduce_mean_kernel(x_ref, o_ref):
    x = x_ref[...].astype(jnp.float32)
    o_ref[...] = (jnp.sum(x, axis=0) * (1.0 / x_ref.shape[0])).astype(o_ref.dtype)


def pallas_window_reduce(stacked, op, tm_target=512):
    k, m, c = stacked.shape
    tm = _pick_tile(m, tm_target)
    kern = _reduce_max_kernel if op == "max" else _reduce_mean_kernel
    return pl.pallas_call(
        kern,
        grid=(m // tm,),
        in_specs=[pl.BlockSpec((k, tm, c), lambda i: (0, i, 0))],
        out_specs=pl.BlockSpec((tm, c), lambda i: (i, 0)),
        out_shape=jax.ShapeDtypeStruct((m, c), stacked.dtype),
        compiler_params=_grid_params(),
    )(stacked)


def maxpool_3x3_s2_p1(x):
    n, h, w, c = x.shape
    k, stride, pad = 3, 2, 1
    xp = jnp.pad(x, ((0, 0), (pad, pad), (pad, pad), (0, 0)),
                 constant_values=float("-inf"))
    ho = (h + 2 * pad - k) // stride + 1
    wo = (w + 2 * pad - k) // stride + 1
    wins = [xp[:, dy:dy + stride * ho:stride, dx:dx + stride * wo:stride, :]
            for dy in range(k) for dx in range(k)]
    stacked = jnp.stack(wins, 0).reshape(k * k, n * ho * wo, c)
    return pallas_window_reduce(stacked, "max").reshape(n, ho, wo, c)


def avgpool_2x2_s2(x):
    n, h, w, c = x.shape
    ho, wo = h // 2, w // 2
    wins = [x[:, dy:2 * ho:2, dx:2 * wo:2, :] for dy in range(2) for dx in range(2)]
    stacked = jnp.stack(wins, 0).reshape(4, n * ho * wo, c)
    return pallas_window_reduce(stacked, "mean").reshape(n, ho, wo, c)


# ------------------ fused tail: BN + ReLU + GAP + Linear + Sigmoid ------------------

def _tail_kernel(x_ref, s_ref, b_ref, w_ref, bias_ref, o_ref):
    x = x_ref[...].astype(jnp.float32)                       # (N, S, C)
    y = jnp.maximum(x * s_ref[...] + b_ref[...], 0.0)
    pooled = jnp.sum(y, axis=1) * (1.0 / x_ref.shape[1])     # (N, C) global avg pool
    z = jnp.dot(pooled, w_ref[...], preferred_element_type=jnp.float32) + bias_ref[...]
    o_ref[...] = 1.0 / (1.0 + jnp.exp(-z))


def pallas_tail(feat_nsc, s5, b5, w_pad_t, bias_pad):
    n, s, c = feat_nsc.shape
    npad = int(w_pad_t.shape[1])
    return pl.pallas_call(
        _tail_kernel,
        out_shape=jax.ShapeDtypeStruct((n, npad), jnp.float32),
        compiler_params=_plain_params(),
    )(feat_nsc.astype(jnp.bfloat16),
      s5.reshape(1, 1, c).astype(jnp.float32),
      b5.reshape(1, 1, c).astype(jnp.float32),
      w_pad_t.astype(jnp.float32),
      bias_pad.reshape(1, npad).astype(jnp.float32))


# ------------------------------ JAX glue ------------------------------

def im2col(x, kh, kw, stride, pad, pad_value=0.0):
    n, h, w, c = x.shape
    xp = jnp.pad(x, ((0, 0), (pad, pad), (pad, pad), (0, 0)),
                 constant_values=pad_value) if pad else x
    ho = (h + 2 * pad - kh) // stride + 1
    wo = (w + 2 * pad - kw) // stride + 1
    cols = [xp[:, dy:dy + stride * ho:stride, dx:dx + stride * wo:stride, :]
            for dy in range(kh) for dx in range(kw)]
    patches = jnp.concatenate(cols, axis=-1)                  # (N, Ho, Wo, kh*kw*C)
    return patches.reshape(n * ho * wo, kh * kw * c), (ho, wo)


def fold_bn(bn):
    scale = bn["gamma"] * jax.lax.rsqrt(bn["var"] + BN_EPS)
    shift = bn["beta"] - bn["mean"] * scale
    return scale.astype(jnp.float32), shift.astype(jnp.float32)


def conv_w_mat(w):
    # (Cout, Cin, kh, kw) -> (kh*kw*Cin, Cout), bf16 for the MXU.
    cout, cin, kh, kw = w.shape
    return jnp.transpose(w, (2, 3, 1, 0)).reshape(kh * kw * cin, cout).astype(jnp.bfloat16)


# ---------------------------- Parameter init ----------------------------

def init_bn_params(c):
    # PyTorch defaults: weight=1, bias=0, running_mean=0, running_var=1
    return dict(gamma=jnp.ones((c,), jnp.float32), beta=jnp.zeros((c,), jnp.float32),
                mean=jnp.zeros((c,), jnp.float32), var=jnp.ones((c,), jnp.float32))


def init_conv_params(key, cout, cin, kh, kw):
    fan_in = cin * kh * kw
    std = (2.0 / fan_in) ** 0.5  # kaiming-normal, as in torchvision densenet init
    return std * jax.random.normal(key, (cout, cin, kh, kw), jnp.float32)


def init_densenet121_params(key, out_size):
    keys = iter(jax.random.split(key, 512))
    params = {}
    params["conv0"] = init_conv_params(next(keys), INIT_FEATURES, 3, 7, 7)
    params["norm0"] = init_bn_params(INIT_FEATURES)
    num_features = INIT_FEATURES
    blocks = []
    for bi, num_layers in enumerate(BLOCK_CONFIG):
        layers = []
        for li in range(num_layers):
            in_f = num_features + li * GROWTH
            layers.append(dict(
                norm1=init_bn_params(in_f),
                conv1=init_conv_params(next(keys), BN_SIZE * GROWTH, in_f, 1, 1),
                norm2=init_bn_params(BN_SIZE * GROWTH),
                conv2=init_conv_params(next(keys), GROWTH, BN_SIZE * GROWTH, 3, 3),
            ))
        num_features += num_layers * GROWTH
        trans = None
        if bi != len(BLOCK_CONFIG) - 1:
            trans = dict(norm=init_bn_params(num_features),
                         conv=init_conv_params(next(keys), num_features // 2,
                                               num_features, 1, 1))
            num_features //= 2
        blocks.append(dict(layers=layers, transition=trans))
    params["blocks"] = blocks
    params["norm5"] = init_bn_params(num_features)  # num_features == 1024
    kw_, kb_ = jax.random.split(next(keys))
    bound = 1.0 / (num_features ** 0.5)  # default nn.Linear init range
    params["classifier_w"] = jax.random.uniform(kw_, (out_size, num_features),
                                                jnp.float32, -bound, bound)
    params["classifier_b"] = jax.random.uniform(kb_, (out_size,), jnp.float32, -bound, bound)
    return params


def prepare_params(params):
    """Fold BN into scale/shift, pre-convert conv weights to bf16 matmul operands, and
    pad/transpose the classifier to a lane-dense (1024, 128*k) layout."""
    prep = {"conv0": conv_w_mat(params["conv0"]), "norm0": fold_bn(params["norm0"])}
    blocks = []
    for blk in params["blocks"]:
        layers = []
        for l in blk["layers"]:
            layers.append(dict(bn1=fold_bn(l["norm1"]), w1=conv_w_mat(l["conv1"]),
                               bn2=fold_bn(l["norm2"]), w2=conv_w_mat(l["conv2"])))
        trans = None
        if blk["transition"] is not None:
            trans = dict(bn=fold_bn(blk["transition"]["norm"]),
                         w=conv_w_mat(blk["transition"]["conv"]))
        blocks.append(dict(layers=layers, transition=trans))
    prep["blocks"] = blocks
    prep["norm5"] = fold_bn(params["norm5"])
    w = params["classifier_w"]
    b = params["classifier_b"]
    out_size, nf = int(w.shape[0]), int(w.shape[1])
    npad = ((out_size + 127) // 128) * 128
    w_pad = jnp.zeros((npad, nf), jnp.float32).at[:out_size].set(w)
    b_pad = jnp.zeros((npad,), jnp.float32).at[:out_size].set(b)
    prep["classifier_w"] = jnp.transpose(w_pad)   # (1024, npad)
    prep["classifier_b"] = b_pad
    prep["out_size"] = out_size
    return prep


# ------------------------------- Forward -------------------------------

def densenet121_forward(prep, x_nchw):
    x = jnp.transpose(x_nchw, (0, 2, 3, 1)).astype(jnp.bfloat16)  # NCHW -> NHWC, bf16
    n = x.shape[0]

    # stem: conv0(7x7,s2,p3) + norm0 + relu fused, then 3x3/s2/p1 maxpool
    patches, (ho, wo) = im2col(x, 7, 7, 2, 3)
    y = fused_conv_matmul([patches], prep["conv0"], epilogue_bn=prep["norm0"])
    y = y.reshape(n, ho, wo, INIT_FEATURES)
    y = maxpool_3x3_s2_p1(y)
    nb, hb, wb, cb = y.shape
    chunks = [y.reshape(nb * hb * wb, cb)]     # virtual concat: list of channel chunks
    spatial = (nb, hb, wb)

    for block in prep["blocks"]:
        for layer in block["layers"]:
            # norm1+relu (prologue) -> 1x1 conv -> norm2+relu (epilogue): one kernel
            bott = fused_conv_matmul(chunks, layer["w1"],
                                     prologue=layer["bn1"], epilogue_bn=layer["bn2"])
            nb, hb, wb = spatial
            bott = bott.reshape(nb, hb, wb, BN_SIZE * GROWTH)
            # 3x3 conv (im2col glue + tiled matmul); output is this layer's new 32 channels
            patches, _ = im2col(bott, 3, 3, 1, 1)
            newf = fused_conv_matmul([patches], layer["w2"])
            chunks.append(newf)
        if block["transition"] is not None:
            t = block["transition"]
            y = fused_conv_matmul(chunks, t["w"], prologue=t["bn"])  # norm+relu+1x1 conv
            nb, hb, wb = spatial
            y = y.reshape(nb, hb, wb, int(t["w"].shape[1]))
            y = avgpool_2x2_s2(y)
            nb, hb, wb, cc = y.shape
            spatial = (nb, hb, wb)
            chunks = [y.reshape(nb * hb * wb, cc)]

    # tail: norm5 + relu + global avg pool + Linear + Sigmoid, one fused kernel
    nb, hb, wb = spatial
    feat = jnp.concatenate(chunks, axis=-1).reshape(nb, hb * wb, -1)  # single final concat
    s5, b5 = prep["norm5"]
    out = pallas_tail(feat, s5, b5, prep["classifier_w"], prep["classifier_b"])
    return out[:, :prep["out_size"]]


if __name__ == "__main__":
    key = jax.random.PRNGKey(0)
    pkey, xkey = jax.random.split(key)
    out_size = 14
    params = init_densenet121_params(pkey, out_size)
    prep = prepare_params(params)
    # 32x32 is the smallest spatial size for which every DenseNet-121 pooling stage is valid.
    x = jax.random.normal(xkey, (2, 3, 32, 32), jnp.float32)
    out = densenet121_forward(prep, x)
    out = jax.block_until_ready(out)
    assert out.shape == (2, out_size)
    assert bool(jnp.all((out >= 0.0) & (out <= 1.0)))
    print("KERNEL_OK")
</pallas_src>

<mosaic_0001>
module attributes {stable_mosaic.version = 11 : i64} {
  func.func @kernel(%arg0: i32, %arg1: memref<256x147xbf16, #tpu.memory_space<vmem>>, %arg2: memref<147x64xbf16, #tpu.memory_space<vmem>>, %arg3: memref<1x64xf32, #tpu.memory_space<vmem>>, %arg4: memref<1x64xf32, #tpu.memory_space<vmem>>, %arg5: memref<256x64xbf16, #tpu.memory_space<vmem>>) attributes {dimension_semantics = [#tpu.dimension_semantics<parallel>], iteration_bounds = array<i64: 2>, scalar_prefetch = 0 : i64, scratch_operands = 0 : i64, tpu.core_type = #tpu.core_type<tc>, window_params = [{transform_indices = @transform_0, window_bounds = array<i64: 256, 147>}, {pipeline_mode = #tpu.pipeline_mode<synchronous>, transform_indices = @transform_1, window_bounds = array<i64: 147, 64>}, {pipeline_mode = #tpu.pipeline_mode<synchronous>, transform_indices = @transform_2, window_bounds = array<i64: 1, 64>}, {pipeline_mode = #tpu.pipeline_mode<synchronous>, transform_indices = @transform_3, window_bounds = array<i64: 1, 64>}, {transform_indices = @transform_4, window_bounds = array<i64: 256, 64>}]} {
    %cst = arith.constant 0.000000e+00 : f32
    %0 = vector.broadcast %cst : f32 to vector<256x64xf32>
    %c0 = arith.constant 0 : index
    %c0_0 = arith.constant 0 : index
    %1 = vector.load %arg1[%c0, %c0_0] : memref<256x147xbf16, #tpu.memory_space<vmem>>, vector<256x147xbf16>
    %c0_1 = arith.constant 0 : index
    %c0_2 = arith.constant 0 : index
    %2 = vector.load %arg2[%c0_1, %c0_2] : memref<147x64xbf16, #tpu.memory_space<vmem>>, vector<147x64xbf16>
    %cst_3 = arith.constant dense<0.000000e+00> : vector<256x64xf32>
    %3 = tpu.matmul %1, %2, %cst_3 {dimension_numbers = #tpu.dot_dimension_numbers<[1], [0], [0], [1], [0, 0, 1, 1], [], []>} : vector<256x147xbf16>, vector<147x64xbf16>, vector<256x64xf32> -> vector<256x64xf32>
    %4 = arith.addf %0, %3 : vector<256x64xf32>
    %c0_4 = arith.constant 0 : index
    %c0_5 = arith.constant 0 : index
    %5 = vector.load %arg3[%c0_4, %c0_5] : memref<1x64xf32, #tpu.memory_space<vmem>>, vector<1x64xf32>
    %6 = vector.broadcast %5 : vector<1x64xf32> to vector<256x64xf32>
    %7 = arith.mulf %4, %6 : vector<256x64xf32>
    %c0_6 = arith.constant 0 : index
    %c0_7 = arith.constant 0 : index
    %8 = vector.load %arg4[%c0_6, %c0_7] : memref<1x64xf32, #tpu.memory_space<vmem>>, vector<1x64xf32>
    %9 = vector.broadcast %8 : vector<1x64xf32> to vector<256x64xf32>
    %10 = arith.addf %7, %9 : vector<256x64xf32>
    %cst_8 = arith.constant 0.000000e+00 : f32
    %11 = vector.broadcast %cst_8 : f32 to vector<256x64xf32>
    %12 = arith.maximumf %10, %11 : vector<256x64xf32>
    %13 = arith.truncf %12 : vector<256x64xf32> to vector<256x64xbf16>
    %c0_9 = arith.constant 0 : index
    %c0_10 = arith.constant 0 : index
    %14 = vector.load %arg5[%c0_9, %c0_10] : memref<256x64xbf16, #tpu.memory_space<vmem>>, vector<256x64xbf16>
    tpu.vector_store %arg5[%c0_9, %c0_10], %13 {strides = array<i32>} : memref<256x64xbf16, #tpu.memory_space<vmem>>, vector<256x64xbf16>,
    return
  }
  func.func @transform_0(%arg0: i32) -> (i32, i32) {
    %c0_i32 = arith.constant 0 : i32
    %c0_i32_0 = arith.constant 0 : i32
    return %arg0, %c0_i32 : i32, i32
  }
  func.func @transform_1(%arg0: i32) -> (i32, i32) {
    %c0_i32 = arith.constant 0 : i32
    %c0_i32_0 = arith.constant 0 : i32
    %c0_i32_1 = arith.constant 0 : i32
    return %c0_i32, %c0_i32_0 : i32, i32
  }
  func.func @transform_2(%arg0: i32) -> (i32, i32) {
    %c0_i32 = arith.constant 0 : i32
    %c0_i32_0 = arith.constant 0 : i32
    %c0_i32_1 = arith.constant 0 : i32
    return %c0_i32, %c0_i32_0 : i32, i32
  }
  func.func @transform_3(%arg0: i32) -> (i32, i32) {
    %c0_i32 = arith.constant 0 : i32
    %c0_i32_0 = arith.constant 0 : i32
    %c0_i32_1 = arith.constant 0 : i32
    return %c0_i32, %c0_i32_0 : i32, i32
  }
  func.func @transform_4(%arg0: i32) -> (i32, i32) {
    %c0_i32 = arith.constant 0 : i32
    %c0_i32_0 = arith.constant 0 : i32
    return %arg0, %c0_i32 : i32, i32
  }
}

</mosaic_0001>

<bundles_post_ra>
// kernel: tpu_custom_call.1
= control target key start
LH: loop header
LB: loop body
LE: loop exit
PB: predicated region body
PF: predicated region fallthrough
CT: control target
= control target key end

     0   :  { %9 = vsyncpa [#allocation3], 0  ;;  %s2101_s0 = inlined_call_operand.hbm [shape: bf16[512,147], index: 0, kind: input, shape index: {}]   ;;  %s2102_s1 = inlined_call_operand.hbm [shape: bf16[147,64], index: 1, kind: input, shape index: {}]   ;;  %s2103_s2 = inlined_call_operand.hbm [shape: f32[1,64], index: 2, kind: input, shape index: {}]   ;;  %s2104_s3 = inlined_call_operand.hbm [shape: f32[1,64], index: 3, kind: input, shape index: {}]   ;;  %s2105_s4 = inlined_call_operand.hbm [shape: bf16[512,64], index: 4, kind: output, shape index: {}]  }
   0x1   :  { %11 = vsyncpa [#allocation3 + $0x1], 0 }
   0x2   :  { %12 = vsyncpa [#allocation6], 0 }
   0x3   :  { %13 = vsyncpa [#allocation9], 0 }
   0x4   :  { %14 = vsyncpa [#allocation4], 0 }
   0x5   :  { %16 = vsyncpa [#allocation4 + $0x1], 0  ;;  %s1655_s15 = smov 0   ;;  %s1657_s16 = smov 0  }
   0x6   :  { %s1659_s17 = smov 0   ;;  %s1661_s18 = smov 0  }
   0x7 LB: > { %s1676_s19 = sadd.s32 4294967295, %s1615_s18   ;;  %s1116_s20 = sadd.s32 4294967294, %s1615_s18   ;;  %s1615_s18 = sphi %s1661_s18, %s2128_s18   ;;  %s1611_s17 = sphi %s1659_s17, %s2127_s17   ;;  %s1607_s16 = sphi %s1657_s16, %s2126_s16   ;;  %s1603_s15 = sphi %s1655_s15, %s2125_s15  }
   0x8   : > { %p42_p0 = scmp.ne.s32.totalorder %s1607_s16, %s1603_s15  ;;  %p2106_p1 = scmp.eq.s32.totalorder %s1676_s19, 0 }
   0x9   : > { %p135_p3 = scmp.eq.s32.totalorder %s1116_s20, 1  ;;  %p1117_p5 = scmp.ge.s32.totalorder %s1615_s18, 1 }
   0xa   : > { %p1685_p4 = por %p2106_p1, %p42_p0  ;;  %p142_p7 = scmp.lt.s32.totalorder %s1615_s18, 3 }
   0xb   : > { %p1690_p6 = por %p135_p3, %p42_p0  ;;  %s1617_s24 = smov [#allocation5]  }
   0xc   : > { %s2109_s21 = scalar_select %p1685_p4, 1, 0 }
   0xd   : > { %s2110_s22 = scalar_select %p1690_p6, 1, 0 }
   0xe   : > { %p1695_p8 = pnand %p1117_p5, %p142_p7  ;;  %s154_s25 = sshll.u32 %s1617_s24, 4  ;;  %s1699_s25 = int_to_ptr.vmem [resolvable:$true] %s154_s25 }
   0xf   : > { %s1618_s27 = smov [#allocation7]   ;;  %s1619_s29 = smov [#allocation8]  }
  0x10   : > { %s2111_s23 = scalar_select %p1695_p8, 1, 0 }
  0x11   : > { %p1300_p9 = pneg %p1695_p8  ;;  %s168_s28 = sshll.u32 %s1618_s27, 4  ;;  %s1710_s28 = int_to_ptr.vmem [resolvable:$true] %s168_s28 }
  0x12   : > { %s1712_s30 = sshll.u32 %s1619_s29, 4  ;;  %s1427_s7 = scalar_lea.hbm %s2102_s1, 1216  ;;  %s180_s30 = int_to_ptr.vmem [resolvable:$true] %s1712_s30 }
  0x13   : > { %p1706_p11 = pnand %p1300_p9, %p2106_p1  ;;  %p1428_p12 = scmp.ne.s32.totalorder %s2102_s1, %s1427_s7 }
  0x14   : > { %p1434_p5 = scmp.lt.u32.totalorder %s1427_s7, %s2102_s1 }
  0x15   : > { %p1722_p13 = pneg %p1706_p11 }
  0x17   : > { %p1430_p0 = pnand %p1722_p13, %p1428_p12 }
  0x19   : > { %p1431_p3 = pneg %p1430_p0 }
  0x1b   : > { %p1436_p7 = pnand %p1434_p5, %p1431_p3 }
  0x1d   : > { %1439 = shalt.err (!%p1436_p7)
}
  0x1e   : > { %s1440_s13 = scalar_lea.vmem %s1699_s25, 1216  ;;  %p1448_p2 = scmp.lt.s32.totalorder %s1699_s25, %s1699_s25 }
  0x1f   : > { %p1441_p9 = scmp.ne.s32.totalorder %s1699_s25, %s1440_s13  ;;  %p1449_p6 = scmp.lt.s32.totalorder %s1440_s13, %s1440_s13 }
  0x21   : > { %p1443_p10 = pnand %p1441_p9, %p1722_p13  ;;  %p1450_p12 = por %p1449_p6, %p1448_p2 }
  0x23   : > { %p1444_p1 = pneg %p1443_p10 }
  0x25   : > { %p1451_p0 = pnand %p1450_p12, %p1444_p1 }
  0x27   : > { %1454 = shalt.err (!%p1451_p0)
}
  0x28   : > { %s1620_s14 = smov 64   ;;  %s1621_s20 = smov 4  }
  0x29   : > { %1303 = dma.hbm_to_vmem [thread:$0]  (!%p1706_p11), %s2102_s1, 1216, %s1699_s25, [#allocation6], %s1620_s14, %s1620_s14, %s1621_s20  }
  0x2a   : > { %s1455_s6 = scalar_lea.hbm %s2103_s2, 16 }
  0x2b   : > { %p1456_p2 = scmp.ne.s32.totalorder %s2103_s2, %s1455_s6  ;;  %p1462_p10 = scmp.lt.u32.totalorder %s1455_s6, %s2103_s2 }
  0x2d   : > { %p1458_p1 = pnand %p1456_p2, %p1722_p13 }
  0x2f   : > { %p1459_p6 = pneg %p1458_p1 }
  0x31   : > { %p1464_p3 = pnand %p1462_p10, %p1459_p6 }
  0x33   : > { %1467 = shalt.err (!%p1464_p3)
}
  0x34   : > { %s1468_s25 = scalar_lea.vmem %s1710_s28, 16  ;;  %s1475_s12 = scalar_lea.vmem %s1710_s28, 32 }
  0x35   : > { %p1469_p5 = scmp.ne.s32.totalorder %s1710_s28, %s1468_s25  ;;  %p1476_p12 = scmp.lt.s32.totalorder %s1710_s28, %s1710_s28 }
  0x36   : > { %p1477_p0 = scmp.lt.s32.totalorder %s1475_s12, %s1468_s25 }
  0x37   : > { %p1471_p7 = pnand %p1469_p5, %p1722_p13 }
  0x38   : > { %p1478_p2 = por %p1477_p0, %p1476_p12 }
  0x39   : > { %p1472_p9 = pneg %p1471_p7 }
  0x3b   : > { %p1479_p1 = pnand %p1478_p2, %p1472_p9 }
  0x3d   : > { %1482 = shalt.err (!%p1479_p1)
}
  0x3e   : > { %1306 = dma.hbm_to_vmem [thread:$0]  (!%p1706_p11), %s2103_s2, 16, %s1710_s28, [#allocation6]  }
  0x3f   : > { %s1483_s27 = scalar_lea.hbm %s2104_s3, 16 }
  0x40   : > { %p1484_p6 = scmp.ne.s32.totalorder %s2104_s3, %s1483_s27  ;;  %p1490_p5 = scmp.lt.u32.totalorder %s1483_s27, %s2104_s3 }
  0x42   : > { %p1486_p10 = pnand %p1484_p6, %p1722_p13 }
  0x44   : > { %p1487_p3 = pneg %p1486_p10 }
  0x46   : > { %p1492_p7 = pnand %p1490_p5, %p1487_p3 }
  0x48   : > { %1495 = shalt.err (!%p1492_p7)
}
  0x49   : > { %s1496_s8 = scalar_lea.vmem %s180_s30, 16  ;;  %s1503_s28 = scalar_lea.vmem %s180_s30, 32 }
  0x4a   : > { %p1497_p9 = scmp.ne.s32.totalorder %s180_s30, %s1496_s8  ;;  %p1504_p2 = scmp.lt.s32.totalorder %s180_s30, %s180_s30 }
  0x4b   : > { %p1505_p1 = scmp.lt.s32.totalorder %s1503_s28, %s1496_s8 }
  0x4c   : > { %p1499_p12 = pnand %p1497_p9, %p1722_p13 }
  0x4d   : > { %p1506_p4 = por %p1505_p1, %p1504_p2 }
  0x4e   : > { %p1500_p0 = pneg %p1499_p12 }
  0x50   : > { %p1507_p8 = pnand %p1506_p4, %p1500_p0 }
  0x52   : > { %1510 = shalt.err (!%p1507_p8)
}
  0x53   : > { %1309 = dma.hbm_to_vmem [thread:$0]  (!%p1706_p11), %s2104_s3, 16, %s180_s30, [#allocation9]  }
  0x54   : > { %s1787_s10 = sadd.s32 1, %s1615_s18   ;;  %s29_s26 = sadd.s32 1, %s1611_s17 }
  0x55   : > { %s26_s25 = ssub.s32 %s1615_s18, %s1787_s10  ;;  %p36_p8 = scmp.ne.s32.totalorder %s1611_s17, %s1607_s16 }
  0x56   : > { %p27_p4 = scmp.eq.s32.totalorder %s26_s25, 0  ;;  %p37_p13 = scmp.eq.s32.totalorder %s1615_s18, 0 }
  0x57   : > { %p1321_p6 = scmp.lt.s32.totalorder %s1615_s18, 2  ;;  %p2114_p3 = scmp.eq.s32.totalorder %s1676_s19, 1 }
  0x58   : > { %s1797_s12 = scalar_select %p27_p4, %s1611_s17, %s29_s26  }
  0x59   : > { %p38_p10 = por %p37_p13, %p36_p8  ;;  %p1801_p5 = por %p2114_p3, %p36_p8 }
  0x5a   : > { %s190_s14 = sand.u32 1, %s1611_s17   ;;  %s1230_s20 = sshll.u32 %s1615_s18, 12 }
  0x5b   : > { %s1122_s30 = sshll.u32 %s190_s14, 8  ;;  %s1810_s29 = scalar_lea.hbm %s2101_s0, %s1230_s20 }
  0x5c   : > { %s194_s5 = scalar_lea.vmem [#allocation2], %s1122_s30  ;;  %p1812_p11 = pnand %p1321_p6, %p38_p10 }
  0x5d   : > { %s202_s6 = sshll.u32 %s194_s5, 4  ;;  %s1818_s8 = scalar_lea.sflag [#allocation3], %s190_s14  ;;  %s1816_s6 = int_to_ptr.vmem [resolvable:$true] %s202_s6 }
  0x5e   : > { %s1511_s28 = scalar_lea.hbm %s1810_s29, 4096  ;;  %p1513_p9 = pneg %p1812_p11 }
  0x5f   : > { %p1512_p7 = scmp.ne.s32.totalorder %s1810_s29, %s1511_s28  ;;  %s1516_s25 = scalar_lea.hbm %s2101_s0, 8192 }
  0x60   : > { %p1517_p2 = scmp.lt.u32.totalorder %s1810_s29, %s2101_s0  ;;  %p1518_p1 = scmp.lt.u32.totalorder %s1516_s25, %s1511_s28 }
  0x61   : > { %p1514_p12 = pnand %p1513_p9, %p1512_p7  ;;  %p1520_p8 = scmp.lt.u32.totalorder %s1511_s28, %s1810_s29 }
  0x62   : > { %p1519_p4 = por %p1518_p1, %p1517_p2 }
  0x63   : > { %p1515_p0 = pneg %p1514_p12 }
  0x64   : > { %p1521_p13 = por %p1520_p8, %p1519_p4 }
  0x66   : > { %p1522_p6 = pnand %p1521_p13, %p1515_p0 }
  0x68   : > { %1525 = shalt.err (!%p1522_p6)
}
  0x69   : > { %s1526_s14 = scalar_lea.vmem %s1816_s6, 4096  ;;  %s1622_s30 = smov [#allocation2]  }
  0x6a   : > { %p1527_p10 = scmp.ne.s32.totalorder %s1816_s6, %s1526_s14  ;;  %s1531_s24 = sshll.u32 %s1622_s30, 4  ;;  %s1532_s24 = int_to_ptr.vmem [resolvable:$false] %s1531_s24 }
  0x6b   : > { %s1533_s27 = scalar_lea.vmem %s1532_s24, 8192  ;;  %p1534_p12 = scmp.lt.s32.totalorder %s1816_s6, %s1532_s24 }
  0x6c   : > { %p1529_p3 = pnand %p1527_p10, %p1513_p9  ;;  %p1535_p2 = scmp.lt.s32.totalorder %s1533_s27, %s1526_s14 }
  0x6e   : > { %p1530_p7 = pneg %p1529_p3  ;;  %p1536_p1 = por %p1535_p2, %p1534_p12 }
  0x70   : > { %p1537_p4 = pnand %p1536_p1, %p1530_p7 }
  0x72   : > { %1540 = shalt.err (!%p1537_p4)
}
  0x73   : > { %s1623_s5 = smov 128   ;;  %s1624_s28 = smov 8  }
  0x74   : > { %1313 = dma.hbm_to_vmem [thread:$0]  (!%p1812_p11), %s1810_s29, 4096, %s1816_s6, %s1818_s8, %s1623_s5, %s1623_s5, %s1624_s28  }
  0x75   : > { %p2117_p9 = scmp.ne.s32.totalorder %s2111_s23, 0 }
  0x76   : > { %s1849_s9 = sand.u32 (!%p2117_p9), 1, %s1607_s16   ;;  %p2118_p0 = scmp.ne.s32.totalorder (!%p2117_p9), %s2109_s21, 0 }
  0x77   : > { %214 = sbr.rel (%p2117_p9) target bundleno = 468 (0x1d4), region = 36  ;;  %s1127_s11 = sshll.u32 (!%p2117_p9), %s1849_s9, 8 }
  0x78   : > { %s217_s25 = scalar_lea.sflag (!%p2117_p9), [#allocation3], %s1849_s9  ;;  %s1853_s26 = scalar_lea.vmem (!%p2117_p9), [#allocation2], %s1127_s11 }
  0x7e   : > { %1586 = dma.done.wait (%p2118_p0), %s217_s25, 4096  }
  0x7f   : > { %1588 = vsyncadd (%p2118_p0), %s217_s25, 4294963200  ;;  %p2119_p11 = scmp.eq.s32.totalorder %s1676_s19, 0 }
  0x81   : > { %1590 = dma.done.wait (%p2119_p11), [#allocation6], 1232   ;;  %p2120_p8 = pmov %p2119_p11 }
  0x83   : > { %1592 = vsyncadd (%p2120_p8), [#allocation6], 4294966064  ;;  %p2121_p13 = pmov %p2120_p8 }
  0x84   : > { %p2122_p6 = pmov %p2120_p8 }
  0x85   : > { %1594 = dma.done.wait (%p2121_p13), [#allocation9], 16  }
  0x86   : > { %1596 = vsyncadd (%p2122_p6), [#allocation9], 4294967280  ;;  %v1625_v0 = vmov 0   ;;  %v1369_v1 = vld [vmem:[#allocation5] sm:$0xff]   ;;  %v1370_v2 = vld [vmem:[#allocation5 + $0x8] sm:$0xff]   ;;  %vm512_vm0 = vcmask 154624  }
  0x87   : > { %568 = vmatprep.subr.bf16.mxu0 %v1625_v0  ;;  %1264 = vmatprep.subr.bf16.mxu1 %v1625_v0  ;;  %v1371_v3 = vld [vmem:[#allocation5 + $0x10] sm:$0xff]   ;;  %v1372_v4 = vld [vmem:[#allocation5 + $0x18] sm:$0xff]   ;;  %v1381_v5 = vld [vmem:[%s1853_s26 + $0x4] ss:$8 sps:$4 sm:$0xff]   ;;  %vm561_vm1 = vcmask 1040384   ;;  %vm562_vm2 = vcmask 1041408  }
  0x88   : > { %569 = vmatpush1.bf16.msra.mxu0 %v1369_v1  ;;  %1274 = vmatpush1.bf16.msra.mxu1 %v1369_v1  ;;  %v1384_v6 = vld [vmem:[%s1853_s26 + $0x84] ss:$8 sps:$4 sm:$0xff]   ;;  %v1375_v9 = vld [vmem:[#allocation5 + $0x30] sm:$0xff]   ;;  %v1376_v10 = vld [vmem:[#allocation5 + $0x38] sm:$0xff]   ;;  %v1626_v11 = vmov 65535   ;;  %s1131_s21 = sshll.u32 %s1849_s9, 7 }
  0x89   : > { %570 = vmatprep.subr.bf16.mxu0 %v1625_v0  ;;  %1265 = vmatprep.subr.bf16.mxu1 %v1625_v0  ;;  %v1373_v7 = vld [vmem:[#allocation5 + $0x20] sm:$0xff]   ;;  %v1374_v8 = vld [vmem:[#allocation5 + $0x28] sm:$0xff]   ;;  %v563_v12 = vsel %vm561_vm1, 4294967295, %v1626_v11  ;;  %v1385_v19 = vld [vmem:[%s1853_s26 + $0x14] ss:$8 sps:$4 sm:$0xff]   ;;  %vm967_vm3 = vcmask 519168  }
  0x8a   : > { %1174 = vmatprep.mubr.msk.bf16.mxu0 %vm512_vm0, %v1381_v5  ;;  %1182 = vmatprep.mubr.msk.bf16.mxu1 %vm512_vm0, %v1384_v6  ;;  %v1377_v13 = vld [vmem:[#allocation5 + $0x40] sm:$0xff]   ;;  %v1378_v14 = vld [vmem:[#allocation5 + $0x48] ss:$0 sps:$4 sm:$0x33]   ;;  %v564_v15 = vsel %vm562_vm2, %v563_v12, 0  ;;  %s1928_s23 = scalar_lea.vmem [#allocation10], %s1131_s21 }
  0x8b   : > { %v566_v16 = vand.u32 %v1378_v14, %v564_v15  ;;  %v1379_v17 = vld [vmem:[%s1853_s26] ss:$8 sps:$4 sm:$0xff]   ;;  %v1387_v20 = vld [vmem:[%s1853_s26 + $0x94] ss:$8 sps:$4 sm:$0xff]   ;;  %v1389_v21 = vld [vmem:[%s1853_s26 + $0x10] ss:$8 sps:$4 sm:$0xff]  }
  0x8c   : > { %571 = vmatpush1.bf16.msra.mxu0 %v1370_v2  ;;  %1275 = vmatpush1.bf16.msra.mxu1 %v1370_v2  ;;  %v1382_v18 = vld [vmem:[%s1853_s26 + $0x80] ss:$8 sps:$4 sm:$0xff]   ;;  %v1390_v22 = vld [vmem:[%s1853_s26 + $0x90] ss:$8 sps:$4 sm:$0xff]   ;;  %v1391_v23 = vld [vmem:[%s1853_s26 + $0x24] ss:$8 sps:$4 sm:$0xff]  }
  0x8d   : > { %572 = vmatprep.subr.bf16.mxu0 %v1625_v0  ;;  %1266 = vmatprep.subr.bf16.mxu1 %v1625_v0  ;;  %v1393_v24 = vld [vmem:[%s1853_s26 + $0xa4] ss:$8 sps:$4 sm:$0xff]   ;;  %v1395_v25 = vld [vmem:[%s1853_s26 + $0x20] ss:$8 sps:$4 sm:$0xff]   ;;  %v1397_v27 = vld [vmem:[%s1853_s26 + $0x34] ss:$8 sps:$4 sm:$0xff]  }
  0x8e   : > { %v1396_v26 = vld [vmem:[%s1853_s26 + $0xa0] ss:$8 sps:$4 sm:$0xff]   ;;  %v1399_v28 = vld [vmem:[%s1853_s26 + $0xb4] ss:$8 sps:$4 sm:$0xff]   ;;  %v1401_v29 = vld [vmem:[%s1853_s26 + $0x30] ss:$8 sps:$4 sm:$0xff]  }
  0x8f   : > { %v1402_v30 = vld [vmem:[%s1853_s26 + $0xb0] ss:$8 sps:$4 sm:$0xff]   ;;  %v1403_v31 = vld [vmem:[%s1853_s26 + $0x44] ss:$8 sps:$4 sm:$0xff]   ;;  %v1407_v33 = vld [vmem:[%s1853_s26 + $0x40] ss:$8 sps:$4 sm:$0xff]  }
  0x90   : > { %573 = vmatpush1.bf16.msra.mxu0 %v1371_v3  ;;  %1276 = vmatpush1.bf16.msra.mxu1 %v1371_v3  ;;  %v1405_v32 = vld [vmem:[%s1853_s26 + $0xc4] ss:$8 sps:$4 sm:$0xff]   ;;  %v1408_v34 = vld [vmem:[%s1853_s26 + $0xc0] ss:$8 sps:$4 sm:$0xff]   ;;  %v1409_v35 = vld [vmem:[%s1853_s26 + $0x54] ss:$8 sps:$4 sm:$0xff]  }
  0x91   : > { %574 = vmatprep.subr.bf16.mxu0 %v1625_v0  ;;  %1267 = vmatprep.subr.bf16.mxu1 %v1625_v0  ;;  %v1411_v36 = vld [vmem:[%s1853_s26 + $0xd4] ss:$8 sps:$4 sm:$0xff]   ;;  %v1413_v37 = vld [vmem:[%s1853_s26 + $0x50] ss:$8 sps:$4 sm:$0xff]   ;;  %v1415_v39 = vld [vmem:[%s1853_s26 + $0x64] ss:$8 sps:$4 sm:$0xff]  }
  0x92   : > { %v1414_v38 = vld [vmem:[%s1853_s26 + $0xd0] ss:$8 sps:$4 sm:$0xff]   ;;  %v1417_v40 = vld [vmem:[%s1853_s26 + $0xe4] ss:$8 sps:$4 sm:$0xff]   ;;  %v1419_v41 = vld [vmem:[%s1853_s26 + $0x60] ss:$8 sps:$4 sm:$0xff]  }
  0x93   : > { %v1420_v42 = vld [vmem:[%s1853_s26 + $0xe0] ss:$8 sps:$4 sm:$0xff]   ;;  %v1421_v43 = vld [vmem:[%s1853_s26 + $0x74] ss:$8 sps:$4 sm:$0xff]   ;;  %v1425_v45 = vld [vmem:[%s1853_s26 + $0x70] ss:$8 sps:$4 sm:$0xff]  }
  0x94   : > { %575 = vmatpush1.bf16.msra.mxu0 %v1372_v4  ;;  %1277 = vmatpush1.bf16.msra.mxu1 %v1372_v4  ;;  %v1423_v44 = vld [vmem:[%s1853_s26 + $0xf4] ss:$8 sps:$4 sm:$0xff]   ;;  %v1426_v46 = vld [vmem:[%s1853_s26 + $0xf0] ss:$8 sps:$4 sm:$0xff]   ;;  %v1915_v47 = vld [vmem:[#allocation7] ss:$0 sm:$0xff] }
  0x95   : > { %576 = vmatprep.subr.bf16.mxu0 %v1625_v0  ;;  %1268 = vmatprep.subr.bf16.mxu1 %v1625_v0  ;;  %v1917_v49 = vld [vmem:[#allocation8] ss:$0 sm:$0xff]  ;;  %s1263_s29 = sshll.u32 %s1676_s19, 11  ;;  %s1014_s6 = sshll.u32 %s1928_s23, 4  ;;  %s2049_s6 = int_to_ptr.vmem [resolvable:$true] %s1014_s6 }
  0x96   : > { %s2047_s20 = scalar_lea.hbm %s2105_s4, %s1263_s29  ;;  %s1001_s19 = scalar_lea.sflag [#allocation4], %s1849_s9 }
  0x97   : > { %s1541_s14 = scalar_lea.vmem %s2049_s6, 2048  ;;  %s1627_s30 = smov [#allocation10]  }
  0x98   : > { %577 = vmatpush1.bf16.msra.mxu0 %v1373_v7  ;;  %1278 = vmatpush1.bf16.msra.mxu1 %v1373_v7  ;;  %p1542_p10 = scmp.ne.s32.totalorder %s2049_s6, %s1541_s14  ;;  %s1545_s24 = sshll.u32 %s1627_s30, 4  ;;  %s1546_s24 = int_to_ptr.vmem [resolvable:$false] %s1545_s24 }
  0x99   : > { %578 = vmatprep.subr.bf16.mxu0 %v1625_v0  ;;  %1269 = vmatprep.subr.bf16.mxu1 %v1625_v0  ;;  %s1547_s27 = scalar_lea.vmem %s1546_s24, 4096  ;;  %p1548_p12 = scmp.lt.s32.totalorder %s2049_s6, %s1546_s24 }
  0x9a   : > { %p1543_p3 = pnand %p1542_p10, %p1801_p5  ;;  %p1549_p2 = scmp.lt.s32.totalorder %s1547_s27, %s1541_s14 }
  0x9c   : > { %579 = vmatpush1.bf16.msra.mxu0 %v1374_v8  ;;  %1279 = vmatpush1.bf16.msra.mxu1 %v1374_v8  ;;  %p1544_p7 = pneg %p1543_p3  ;;  %p1550_p1 = por %p1549_p2, %p1548_p12 }
  0x9d   : > { %580 = vmatprep.subr.bf16.mxu0 %v1625_v0  ;;  %1270 = vmatprep.subr.bf16.mxu1 %v1625_v0 }
  0x9e   : > { %p1551_p4 = pnand %p1550_p1, %p1544_p7 }
  0xa0   : > { %581 = vmatpush1.bf16.msra.mxu0 %v1375_v9  ;;  %1280 = vmatpush1.bf16.msra.mxu1 %v1375_v9 }
  0xa1   : > { %582 = vmatprep.subr.bf16.mxu0 %v1625_v0  ;;  %1271 = vmatprep.subr.bf16.mxu1 %v1625_v0 }
  0xa4   : > { %583 = vmatpush1.bf16.msra.mxu0 %v1376_v10  ;;  %1281 = vmatpush1.bf16.msra.mxu1 %v1376_v10 }
  0xa5   : > { %584 = vmatprep.subr.bf16.mxu0 %v1625_v0  ;;  %1272 = vmatprep.subr.bf16.mxu1 %v1625_v0 }
  0xa8   : > { %585 = vmatpush1.bf16.msra.mxu0 %v1377_v13  ;;  %1282 = vmatpush1.bf16.msra.mxu1 %v1377_v13 }
  0xa9   : > { %586 = vmatprep.subr.bf16.mxu0 %v1625_v0  ;;  %1273 = vmatprep.subr.bf16.mxu1 %v1625_v0 }
  0xac   : > { %587 = vmatpush1.bf16.msra.mxu0 %v566_v16  ;;  %1283 = vmatpush1.bf16.msra.mxu1 %v566_v16 }
  0xaf   : > { %601 = vmatmul.mubr.bf16.vlgmr.msra.gmra.mrb[0].mxu0 %v1379_v17  ;;  %665 = vmatmul.mubr.bf16.vlgmr.msra.gmra.mrb[0].mxu1 %v1382_v18 }
  0xb0   : > { %1175 = vmatprep.mubr.msk.bf16.mxu0 %vm512_vm0, %v1385_v19  ;;  %1183 = vmatprep.mubr.msk.bf16.mxu1 %vm512_vm0, %v1387_v20 }
  0xb7   : > { %609 = vmatmul.mubr.bf16.gmra.mrb[4].mxu0 %v1389_v21  ;;  %673 = vmatmul.mubr.bf16.gmra.mrb[4].mxu1 %v1390_v22 }
  0xb8   : > { %1176 = vmatprep.mubr.msk.bf16.mxu0 %vm512_vm0, %v1391_v23  ;;  %1184 = vmatprep.mubr.msk.bf16.mxu1 %vm512_vm0, %v1393_v24 }
  0xbf   : > { %617 = vmatmul.mubr.bf16.gmra.mrb[8].mxu0 %v1395_v25  ;;  %681 = vmatmul.mubr.bf16.gmra.mrb[8].mxu1 %v1396_v26 }
  0xc0   : > { %1177 = vmatprep.mubr.msk.bf16.mxu0 %vm512_vm0, %v1397_v27  ;;  %1185 = vmatprep.mubr.msk.bf16.mxu1 %vm512_vm0, %v1399_v28 }
  0xc7   : > { %625 = vmatmul.mubr.bf16.gmra.mrb[12].mxu0 %v1401_v29  ;;  %689 = vmatmul.mubr.bf16.gmra.mrb[12].mxu1 %v1402_v30 }
  0xc8   : > { %1178 = vmatprep.mubr.msk.bf16.mxu0 %vm512_vm0, %v1403_v31  ;;  %1186 = vmatprep.mubr.msk.bf16.mxu1 %vm512_vm0, %v1405_v32 }
  0xcf   : > { %633 = vmatmul.mubr.bf16.gmra.mrb[16].mxu0 %v1407_v33  ;;  %697 = vmatmul.mubr.bf16.gmra.mrb[16].mxu1 %v1408_v34 }
  0xd0   : > { %1179 = vmatprep.mubr.msk.bf16.mxu0 %vm512_vm0, %v1409_v35  ;;  %1187 = vmatprep.mubr.msk.bf16.mxu1 %vm512_vm0, %v1411_v36 }
  0xd7   : > { %641 = vmatmul.mubr.bf16.gmra.mrb[20].mxu0 %v1413_v37  ;;  %705 = vmatmul.mubr.bf16.gmra.mrb[20].mxu1 %v1414_v38 }
  0xd8   : > { %1180 = vmatprep.mubr.msk.bf16.mxu0 %vm512_vm0, %v1415_v39  ;;  %1188 = vmatprep.mubr.msk.bf16.mxu1 %vm512_vm0, %v1417_v40 }
  0xdf   : > { %649 = vmatmul.mubr.bf16.gmra.mrb[24].mxu0 %v1419_v41  ;;  %713 = vmatmul.mubr.bf16.gmra.mrb[24].mxu1 %v1420_v42 }
  0xe0   : > { %1181 = vmatprep.mubr.msk.bf16.mxu0 %vm512_vm0, %v1421_v43  ;;  %1189 = vmatprep.mubr.msk.bf16.mxu1 %vm512_vm0, %v1423_v44 }
  0xe7   : > { %657 = vmatmul.mubr.bf16.gmra.mrb[28].mxu0 %v1425_v45  ;;  %721 = vmatmul.mubr.bf16.gmra.mrb[28].mxu1 %v1426_v46 }
 0x182   : > { %v602_v48 = vpop.f32.mrb[0].mxu0  ;;  %v666_v50 = vpop.f32.mrb[0].mxu1 }
 0x183   : > { %v736_v51 = vmul.f32 %v1915_v47, %v602_v48  ;;  %v752_v52 = vmul.f32 %v1915_v47, %v666_v50  ;;  %v604_v53 = vpop.f32.mrb[1].mxu0  ;;  %v668_v54 = vpop.f32.mrb[1].mxu1 }
 0x184   : > { %v605_v55 = vpop.f32.mrb[2].mxu0  ;;  %v669_v56 = vpop.f32.mrb[2].mxu1 }
 0x185   : > { %v775_v57 = vadd.f32 %v1917_v49, %v736_v51  ;;  %v791_v58 = vadd.f32 %v1917_v49, %v752_v52  ;;  %v737_v59 = vmul.f32 %v1915_v47, %v605_v55  ;;  %v753_v60 = vmul.f32 %v1915_v47, %v669_v56  ;;  %v607_v61 = vpop.f32.mrb[3].mxu0  ;;  %v671_v62 = vpop.f32.mrb[3].mxu1 }
 0x187   : > { %v807_v63 = vmax.f32 %v775_v57, 0.0  ;;  %v823_v0 = vmax.f32 %v791_v58, 0.0  ;;  %v776_v1 = vadd.f32 %v1917_v49, %v737_v59  ;;  %v792_v2 = vadd.f32 %v1917_v49, %v753_v60 }
 0x189   : > { %v1231_v3 = vpack.c.bf16 %v807_v63, %v807_v63  ;;  %v1247_v4 = vpack.c.bf16 %v823_v0, %v823_v0  ;;  %v808_v5 = vmax.f32 %v776_v1, 0.0  ;;  %v824_v6 = vmax.f32 %v792_v2, 0.0 }
 0x18a   : > { %v610_v7 = vpop.f32.mrb[4].mxu0  ;;  %v674_v8 = vpop.f32.mrb[4].mxu1 }
 0x18b   : > { %968 = vst.msk [vmem:[%s1928_s23] sm:$0xf] %vm967_vm3, %v1231_v3  ;;  %984 = vst.msk [vmem:[%s1928_s23 + $0x40] sm:$0xf] %vm967_vm3, %v1247_v4  ;;  %v1232_v9 = vpack.c.bf16 %v808_v5, %v808_v5  ;;  %v1248_v10 = vpack.c.bf16 %v824_v6, %v824_v6  ;;  %v738_v11 = vmul.f32 %v1915_v47, %v610_v7  ;;  %v612_v13 = vpop.f32.mrb[5].mxu0  ;;  %v676_v14 = vpop.f32.mrb[5].mxu1 }
 0x18c   : > { %v754_v12 = vmul.f32 %v1915_v47, %v674_v8  ;;  %v613_v15 = vpop.f32.mrb[6].mxu0  ;;  %v677_v16 = vpop.f32.mrb[6].mxu1 }
 0x18d   : > { %969 = vst.msk [vmem:[%s1928_s23 + $0x4] sm:$0xf] %vm967_vm3, %v1232_v9  ;;  %985 = vst.msk [vmem:[%s1928_s23 + $0x44] sm:$0xf] %vm967_vm3, %v1248_v10  ;;  %v777_v17 = vadd.f32 %v1917_v49, %v738_v11  ;;  %v739_v19 = vmul.f32 %v1915_v47, %v613_v15  ;;  %v755_v20 = vmul.f32 %v1915_v47, %v677_v16  ;;  %v615_v21 = vpop.f32.mrb[7].mxu0  ;;  %v679_v22 = vpop.f32.mrb[7].mxu1 }
 0x18e   : > { %v793_v18 = vadd.f32 %v1917_v49, %v754_v12 }
 0x18f   : > { %v809_v23 = vmax.f32 %v777_v17, 0.0  ;;  %v778_v25 = vadd.f32 %v1917_v49, %v739_v19  ;;  %v794_v26 = vadd.f32 %v1917_v49, %v755_v20 }
 0x190   : > { %v825_v24 = vmax.f32 %v793_v18, 0.0 }
 0x191   : > { %v1233_v27 = vpack.c.bf16 %v809_v23, %v809_v23  ;;  %v810_v29 = vmax.f32 %v778_v25, 0.0  ;;  %v826_v30 = vmax.f32 %v794_v26, 0.0 }
 0x192   : > { %v1249_v28 = vpack.c.bf16 %v825_v24, %v825_v24  ;;  %v618_v31 = vpop.f32.mrb[8].mxu0  ;;  %v682_v32 = vpop.f32.mrb[8].mxu1 }
 0x193   : > { %970 = vst.msk [vmem:[%s1928_s23 + $0x8] sm:$0xf] %vm967_vm3, %v1233_v27  ;;  %v1234_v33 = vpack.c.bf16 %v810_v29, %v810_v29  ;;  %v1250_v34 = vpack.c.bf16 %v826_v30, %v826_v30  ;;  %v740_v35 = vmul.f32 %v1915_v47, %v618_v31  ;;  %v756_v36 = vmul.f32 %v1915_v47, %v682_v32  ;;  %v620_v37 = vpop.f32.mrb[9].mxu0  ;;  %v684_v38 = vpop.f32.mrb[9].mxu1 }
 0x194   : > { %986 = vst.msk [vmem:[%s1928_s23 + $0x48] sm:$0xf] %vm967_vm3, %v1249_v28  ;;  %v621_v39 = vpop.f32.mrb[10].mxu0  ;;  %v685_v40 = vpop.f32.mrb[10].mxu1 }
 0x195   : > { %971 = vst.msk [vmem:[%s1928_s23 + $0xc] sm:$0xf] %vm967_vm3, %v1234_v33  ;;  %987 = vst.msk [vmem:[%s1928_s23 + $0x4c] sm:$0xf] %vm967_vm3, %v1250_v34  ;;  %v779_v41 = vadd.f32 %v1917_v49, %v740_v35  ;;  %v795_v42 = vadd.f32 %v1917_v49, %v756_v36  ;;  %v741_v43 = vmul.f32 %v1915_v47, %v621_v39  ;;  %v623_v45 = vpop.f32.mrb[11].mxu0  ;;  %v687_v46 = vpop.f32.mrb[11].mxu1 }
 0x196   : > { %v757_v44 = vmul.f32 %v1915_v47, %v685_v40 }
 0x197   : > { %v811_v48 = vmax.f32 %v779_v41, 0.0  ;;  %v827_v50 = vmax.f32 %v795_v42, 0.0  ;;  %v780_v51 = vadd.f32 %v1917_v49, %v741_v43 }
 0x198   : > { %v796_v52 = vadd.f32 %v1917_v49, %v757_v44 }
 0x199   : > { %v1235_v53 = vpack.c.bf16 %v811_v48, %v811_v48  ;;  %v1251_v54 = vpack.c.bf16 %v827_v50, %v827_v50  ;;  %v812_v55 = vmax.f32 %v780_v51, 0.0 }
 0x19a   : > { %v828_v56 = vmax.f32 %v796_v52, 0.0  ;;  %v626_v57 = vpop.f32.mrb[12].mxu0  ;;  %v690_v58 = vpop.f32.mrb[12].mxu1 }
 0x19b   : > { %972 = vst.msk [vmem:[%s1928_s23 + $0x10] sm:$0xf] %vm967_vm3, %v1235_v53  ;;  %988 = vst.msk [vmem:[%s1928_s23 + $0x50] sm:$0xf] %vm967_vm3, %v1251_v54  ;;  %v1236_v59 = vpack.c.bf16 %v812_v55, %v812_v55  ;;  %v742_v61 = vmul.f32 %v1915_v47, %v626_v57  ;;  %v758_v62 = vmul.f32 %v1915_v47, %v690_v58  ;;  %v628_v63 = vpop.f32.mrb[13].mxu0  ;;  %v692_v0 = vpop.f32.mrb[13].mxu1 }
 0x19c   : > { %v1252_v60 = vpack.c.bf16 %v828_v56, %v828_v56  ;;  %v629_v1 = vpop.f32.mrb[14].mxu0  ;;  %v693_v2 = vpop.f32.mrb[14].mxu1 }
 0x19d   : > { %973 = vst.msk [vmem:[%s1928_s23 + $0x14] sm:$0xf] %vm967_vm3, %v1236_v59  ;;  %v781_v3 = vadd.f32 %v1917_v49, %v742_v61  ;;  %v797_v4 = vadd.f32 %v1917_v49, %v758_v62  ;;  %v743_v5 = vmul.f32 %v1915_v47, %v629_v1  ;;  %v759_v6 = vmul.f32 %v1915_v47, %v693_v2  ;;  %v631_v7 = vpop.f32.mrb[15].mxu0  ;;  %v695_v8 = vpop.f32.mrb[15].mxu1 }
 0x19e   : > { %989 = vst.msk [vmem:[%s1928_s23 + $0x54] sm:$0xf] %vm967_vm3, %v1252_v60 }
 0x19f   : > { %v813_v9 = vmax.f32 %v781_v3, 0.0  ;;  %v829_v10 = vmax.f32 %v797_v4, 0.0  ;;  %v782_v11 = vadd.f32 %v1917_v49, %v743_v5  ;;  %v798_v12 = vadd.f32 %v1917_v49, %v759_v6 }
 0x1a1   : > { %v1237_v13 = vpack.c.bf16 %v813_v9, %v813_v9  ;;  %v1253_v14 = vpack.c.bf16 %v829_v10, %v829_v10  ;;  %v814_v15 = vmax.f32 %v782_v11, 0.0  ;;  %v830_v16 = vmax.f32 %v798_v12, 0.0 }
 0x1a2   : > { %v634_v17 = vpop.f32.mrb[16].mxu0  ;;  %v698_v18 = vpop.f32.mrb[16].mxu1 }
 0x1a3   : > { %974 = vst.msk [vmem:[%s1928_s23 + $0x18] sm:$0xf] %vm967_vm3, %v1237_v13  ;;  %990 = vst.msk [vmem:[%s1928_s23 + $0x58] sm:$0xf] %vm967_vm3, %v1253_v14  ;;  %v1238_v19 = vpack.c.bf16 %v814_v15, %v814_v15  ;;  %v1254_v20 = vpack.c.bf16 %v830_v16, %v830_v16  ;;  %v744_v21 = vmul.f32 %v1915_v47, %v634_v17  ;;  %v636_v23 = vpop.f32.mrb[17].mxu0  ;;  %v700_v24 = vpop.f32.mrb[17].mxu1 }
 0x1a4   : > { %v760_v22 = vmul.f32 %v1915_v47, %v698_v18  ;;  %v637_v25 = vpop.f32.mrb[18].mxu0  ;;  %v701_v26 = vpop.f32.mrb[18].mxu1 }
 0x1a5   : > { %975 = vst.msk [vmem:[%s1928_s23 + $0x1c] sm:$0xf] %vm967_vm3, %v1238_v19  ;;  %991 = vst.msk [vmem:[%s1928_s23 + $0x5c] sm:$0xf] %vm967_vm3, %v1254_v20  ;;  %v783_v27 = vadd.f32 %v1917_v49, %v744_v21  ;;  %v745_v29 = vmul.f32 %v1915_v47, %v637_v25  ;;  %v761_v30 = vmul.f32 %v1915_v47, %v701_v26  ;;  %v639_v31 = vpop.f32.mrb[19].mxu0  ;;  %v703_v32 = vpop.f32.mrb[19].mxu1 }
 0x1a6   : > { %v799_v28 = vadd.f32 %v1917_v49, %v760_v22 }
 0x1a7   : > { %v815_v33 = vmax.f32 %v783_v27, 0.0  ;;  %v784_v35 = vadd.f32 %v1917_v49, %v745_v29  ;;  %v800_v36 = vadd.f32 %v1917_v49, %v761_v30 }
 0x1a8   : > { %v831_v34 = vmax.f32 %v799_v28, 0.0 }
 0x1a9   : > { %v1239_v37 = vpack.c.bf16 %v815_v33, %v815_v33  ;;  %v816_v39 = vmax.f32 %v784_v35, 0.0  ;;  %v832_v40 = vmax.f32 %v800_v36, 0.0 }
 0x1aa   : > { %v1255_v38 = vpack.c.bf16 %v831_v34, %v831_v34  ;;  %v642_v41 = vpop.f32.mrb[20].mxu0  ;;  %v706_v42 = vpop.f32.mrb[20].mxu1 }
 0x1ab   : > { %976 = vst.msk [vmem:[%s1928_s23 + $0x20] sm:$0xf] %vm967_vm3, %v1239_v37  ;;  %v1240_v43 = vpack.c.bf16 %v816_v39, %v816_v39  ;;  %v1256_v44 = vpack.c.bf16 %v832_v40, %v832_v40  ;;  %v746_v45 = vmul.f32 %v1915_v47, %v642_v41  ;;  %v762_v46 = vmul.f32 %v1915_v47, %v706_v42  ;;  %v644_v48 = vpop.f32.mrb[21].mxu0  ;;  %v708_v50 = vpop.f32.mrb[21].mxu1 }
 0x1ac   : > { %992 = vst.msk [vmem:[%s1928_s23 + $0x60] sm:$0xf] %vm967_vm3, %v1255_v38  ;;  %v645_v51 = vpop.f32.mrb[22].mxu0  ;;  %v709_v52 = vpop.f32.mrb[22].mxu1 }
 0x1ad   : > { %977 = vst.msk [vmem:[%s1928_s23 + $0x24] sm:$0xf] %vm967_vm3, %v1240_v43  ;;  %993 = vst.msk [vmem:[%s1928_s23 + $0x64] sm:$0xf] %vm967_vm3, %v1256_v44  ;;  %v785_v53 = vadd.f32 %v1917_v49, %v746_v45  ;;  %v801_v54 = vadd.f32 %v1917_v49, %v762_v46  ;;  %v747_v55 = vmul.f32 %v1915_v47, %v645_v51  ;;  %v647_v57 = vpop.f32.mrb[23].mxu0  ;;  %v711_v58 = vpop.f32.mrb[23].mxu1 }
 0x1ae   : > { %v763_v56 = vmul.f32 %v1915_v47, %v709_v52 }
 0x1af   : > { %v817_v59 = vmax.f32 %v785_v53, 0.0  ;;  %v833_v60 = vmax.f32 %v801_v54, 0.0  ;;  %v786_v61 = vadd.f32 %v1917_v49, %v747_v55 }
 0x1b0   : > { %v802_v62 = vadd.f32 %v1917_v49, %v763_v56 }
 0x1b1   : > { %v1241_v63 = vpack.c.bf16 %v817_v59, %v817_v59  ;;  %v1257_v0 = vpack.c.bf16 %v833_v60, %v833_v60  ;;  %v818_v1 = vmax.f32 %v786_v61, 0.0 }
 0x1b2   : > { %v834_v2 = vmax.f32 %v802_v62, 0.0  ;;  %v650_v3 = vpop.f32.mrb[24].mxu0  ;;  %v714_v4 = vpop.f32.mrb[24].mxu1 }
 0x1b3   : > { %978 = vst.msk [vmem:[%s1928_s23 + $0x28] sm:$0xf] %vm967_vm3, %v1241_v63  ;;  %994 = vst.msk [vmem:[%s1928_s23 + $0x68] sm:$0xf] %vm967_vm3, %v1257_v0  ;;  %v1242_v5 = vpack.c.bf16 %v818_v1, %v818_v1  ;;  %v748_v7 = vmul.f32 %v1915_v47, %v650_v3  ;;  %v764_v8 = vmul.f32 %v1915_v47, %v714_v4  ;;  %v652_v9 = vpop.f32.mrb[25].mxu0  ;;  %v716_v10 = vpop.f32.mrb[25].mxu1 }
 0x1b4   : > { %v1258_v6 = vpack.c.bf16 %v834_v2, %v834_v2  ;;  %v653_v11 = vpop.f32.mrb[26].mxu0  ;;  %v717_v12 = vpop.f32.mrb[26].mxu1 }
 0x1b5   : > { %979 = vst.msk [vmem:[%s1928_s23 + $0x2c] sm:$0xf] %vm967_vm3, %v1242_v5  ;;  %v787_v13 = vadd.f32 %v1917_v49, %v748_v7  ;;  %v803_v14 = vadd.f32 %v1917_v49, %v764_v8  ;;  %v749_v15 = vmul.f32 %v1915_v47, %v653_v11  ;;  %v765_v16 = vmul.f32 %v1915_v47, %v717_v12  ;;  %v655_v17 = vpop.f32.mrb[27].mxu0  ;;  %v719_v18 = vpop.f32.mrb[27].mxu1 }
 0x1b6   : > { %995 = vst.msk [vmem:[%s1928_s23 + $0x6c] sm:$0xf] %vm967_vm3, %v1258_v6 }
 0x1b7   : > { %v819_v19 = vmax.f32 %v787_v13, 0.0  ;;  %v835_v20 = vmax.f32 %v803_v14, 0.0  ;;  %v788_v21 = vadd.f32 %v1917_v49, %v749_v15  ;;  %v804_v22 = vadd.f32 %v1917_v49, %v765_v16 }
 0x1b9   : > { %v1243_v23 = vpack.c.bf16 %v819_v19, %v819_v19  ;;  %v1259_v24 = vpack.c.bf16 %v835_v20, %v835_v20  ;;  %v820_v25 = vmax.f32 %v788_v21, 0.0  ;;  %v836_v26 = vmax.f32 %v804_v22, 0.0 }
 0x1ba   : > { %v658_v27 = vpop.f32.mrb[28].mxu0  ;;  %v722_v28 = vpop.f32.mrb[28].mxu1 }
 0x1bb   : > { %980 = vst.msk [vmem:[%s1928_s23 + $0x30] sm:$0xf] %vm967_vm3, %v1243_v23  ;;  %996 = vst.msk [vmem:[%s1928_s23 + $0x70] sm:$0xf] %vm967_vm3, %v1259_v24  ;;  %v1244_v29 = vpack.c.bf16 %v820_v25, %v820_v25  ;;  %v1260_v30 = vpack.c.bf16 %v836_v26, %v836_v26  ;;  %v750_v31 = vmul.f32 %v1915_v47, %v658_v27  ;;  %v660_v33 = vpop.f32.mrb[29].mxu0  ;;  %v724_v34 = vpop.f32.mrb[29].mxu1 }
 0x1bc   : > { %v766_v32 = vmul.f32 %v1915_v47, %v722_v28  ;;  %v661_v35 = vpop.f32.mrb[30].mxu0  ;;  %v725_v36 = vpop.f32.mrb[30].mxu1 }
 0x1bd   : > { %981 = vst.msk [vmem:[%s1928_s23 + $0x34] sm:$0xf] %vm967_vm3, %v1244_v29  ;;  %997 = vst.msk [vmem:[%s1928_s23 + $0x74] sm:$0xf] %vm967_vm3, %v1260_v30  ;;  %v789_v37 = vadd.f32 %v1917_v49, %v750_v31  ;;  %v751_v39 = vmul.f32 %v1915_v47, %v661_v35  ;;  %v767_v40 = vmul.f32 %v1915_v47, %v725_v36  ;;  %v663_v41 = vpop.f32.mrb[31].mxu0  ;;  %v727_v42 = vpop.f32.mrb[31].mxu1 }
 0x1be   : > { %v805_v38 = vadd.f32 %v1917_v49, %v766_v32 }
 0x1bf   : > { %v821_v43 = vmax.f32 %v789_v37, 0.0  ;;  %v790_v45 = vadd.f32 %v1917_v49, %v751_v39  ;;  %v806_v46 = vadd.f32 %v1917_v49, %v767_v40 }
 0x1c0   : > { %v837_v44 = vmax.f32 %v805_v38, 0.0 }
 0x1c1   : > { %v1245_v48 = vpack.c.bf16 %v821_v43, %v821_v43  ;;  %v822_v51 = vmax.f32 %v790_v45, 0.0  ;;  %v838_v52 = vmax.f32 %v806_v46, 0.0 }
 0x1c2   : > { %v1261_v50 = vpack.c.bf16 %v837_v44, %v837_v44 }
 0x1c3   : > { %982 = vst.msk [vmem:[%s1928_s23 + $0x38] sm:$0xf] %vm967_vm3, %v1245_v48  ;;  %v1246_v47 = vpack.c.bf16 %v822_v51, %v822_v51  ;;  %v1262_v49 = vpack.c.bf16 %v838_v52, %v838_v52 }
 0x1c4   : > { %998 = vst.msk [vmem:[%s1928_s23 + $0x78] sm:$0xf] %vm967_vm3, %v1261_v50 }
 0x1c5   : > { %983 = vst.msk [vmem:[%s1928_s23 + $0x3c] sm:$0xf] %vm967_vm3, %v1246_v47  ;;  %999 = vst.msk [vmem:[%s1928_s23 + $0x7c] sm:$0xf] %vm967_vm3, %v1262_v49 }
 0x1c6   : > { %1554 = shalt.err (!%p1551_p4)
}
 0x1c7   : > { %s1555_s5 = scalar_lea.hbm %s2047_s20, 2048  ;;  %s1559_s25 = scalar_lea.hbm %s2105_s4, 4096 }
 0x1c8   : > { %p1556_p9 = scmp.ne.s32.totalorder %s2047_s20, %s1555_s5  ;;  %p1560_p8 = scmp.lt.u32.totalorder %s2047_s20, %s2105_s4 }
 0x1c9   : > { %p1561_p13 = scmp.lt.u32.totalorder %s1559_s25, %s1555_s5  ;;  %p1563_p10 = scmp.lt.u32.totalorder %s1555_s5, %s2047_s20 }
 0x1ca   : > { %p1557_p0 = pnand %p1556_p9, %p1801_p5 }
 0x1cb   : > { %p1562_p6 = por %p1561_p13, %p1560_p8 }
 0x1cc   : > { %p1558_p11 = pneg %p1557_p0 }
 0x1cd   : > { %p1564_p3 = por %p1563_p10, %p1562_p6 }
 0x1cf   : > { %p1565_p7 = pnand %p1564_p3, %p1558_p11 }
 0x1d1   : > { %1568 = shalt.err (!%p1565_p7)
}
 0x1d2   : > { %s1628_s23 = smov 64   ;;  %s1629_s29 = smov 4  }
 0x1d3   : > { %1298 = dma.vmem_to_hbm [thread:$0]  (%p1801_p5), %s2049_s6, 2048, %s2047_s20, %s1001_s19, %s1628_s23, %s1628_s23, %s1629_s29  }
 0x1d4 PF: > { %s1029_s7 = sand.u32 1, %s1603_s15   ;;  %p2123_p12 = scmp.ne.s32.totalorder %s2110_s22, 0 }
 0x1d5   : > { %p2124_p2 = scmp.ge.s32.totalorder %s1615_s18, 2  ;;  %s1030_s8 = scalar_lea.sflag [#allocation4], %s1029_s7 }
 0x1d7   : > { %p1315_p1 = pnand %p2124_p2, %p2123_p12 }
 0x1d9   : > { %1598 = dma.done.wait (!%p1315_p1), %s1030_s8, 2048  }
 0x1da   : > { %1600 = vsyncadd (!%p1315_p1), %s1030_s8, 4294965248  ;;  %p19_p4 = scmp.ge.s32.totalorder %s1787_s10, 4   ;;  %s2125_s15 = smov %s1607_s16 }
 0x1db   : > { %s2126_s16 = smov %s1611_s17  ;;  %s2127_s17 = smov %s1797_s12 }
 0x1dc   : > { %s2128_s18 = smov %s1787_s10  ;;  %21 = sbr.rel (!%p19_p4) target bundleno = 7 (0x7), region = 93 }
 0x1e3   :  { %1035 = vsyncpa [#allocation3], 1 }
 0x1e4   :  { %1037 = vsyncpa [#allocation3 + $0x1], 1 }
 0x1e5   :  { %1038 = vsyncpa [#allocation6], 1 }
 0x1e6   :  { %1039 = vsyncpa [#allocation9], 1 }
 0x1e7   :  { %1040 = vsyncpa [#allocation4], 1 }
 0x1e8   :  { %1042 = vsyncpa [#allocation4 + $0x1], 1 }

</bundles_post_ra>
